<compile_context>
chip_gen: v6e
topology: v6e:2x2x1
jax: 0.10.0
libtpu: 0.0.40
codegen_flags: <defaults>
</compile_context>

<pallas_src>
import functools

import jax
import jax.numpy as jnp
from jax.experimental import pallas as pl
from jax.experimental.pallas import tpu as pltpu


_LANE = 128
_MAX_CHUNK = 32          # recurrence steps folded (fully unrolled) into one grid step


def _round_up(x, m):
    return ((x + m - 1) // m) * m


# ---------------------------------------------------------------------------
# Parameter preparation (done once, not on the per-call hot path)
# ---------------------------------------------------------------------------
def prepare_params(params, input_size, hidden_size, embed_size):
    """Build kernel-ready layouts.

    params (PyTorch nn.Linear layout):
      W_emb [embed, hidden], b_emb [embed]
      W_ih  [hidden, input+embed], b_ih [hidden]

    Returns dict with:
      w_rec [P, P] bf16   recurrent weight, P = round_up(hidden+embed, 128)
          state columns are [h | m | pad]; block structure:
              h_prev rows : [ 0  , W_emb^T , 0 ]     (-> m_t)
              m_prev rows : [ Wm , 0       , 0 ]     (-> h_t)
              pad rows    : 0
      wx    [input, hidden] f32   (used by the wrapper's hoisted x-projection)
      b_ih  [hidden] f32, b_emb [embed] f32
    """
    f32 = jnp.float32
    HE = hidden_size + embed_size
    P = _round_up(HE, _LANE)

    W_emb_t = params["W_emb"].astype(f32).T            # [hidden, embed]
    W_ih_t = params["W_ih"].astype(f32).T              # [input+embed, hidden]
    wx = W_ih_t[:input_size, :]                        # [input, hidden]
    wm = W_ih_t[input_size:, :]                        # [embed, hidden]

    w_rec = jnp.zeros((P, P), f32)
    w_rec = w_rec.at[hidden_size:HE, :hidden_size].set(wm)        # m_prev -> h_t
    w_rec = w_rec.at[:hidden_size, hidden_size:HE].set(W_emb_t)   # h_prev -> m_t
    w_rec = w_rec.astype(jnp.bfloat16)

    return {
        "w_rec": w_rec,
        "wx": wx,
        "b_ih": params["b_ih"].astype(f32),
        "b_emb": params["b_emb"].astype(f32),
    }


# ---------------------------------------------------------------------------
# Kernel
# ---------------------------------------------------------------------------
def _make_kernel(hidden_size, n_steps, activation):
    if activation == "tanh":
        act = jnp.tanh                                  # EUP
    elif activation == "relu":
        act = lambda v: jnp.maximum(v, 0.0)             # VPU
    else:
        raise ValueError("Unsupported activation function")

    def kernel(add_ref, w_ref, hm0_ref, out_ref, state_ref):
        # Load the initial [h0 | m0 | 0] state into the carried VMEM scratch.
        @pl.when(pl.program_id(0) == 0)
        def _init():
            state_ref[...] = hm0_ref[...]

        w = w_ref[...]                                  # resident bf16 [P, P]
        B, P = state_ref.shape

        # Hoisted, loop-invariant activation column mask (h columns only).
        col = jax.lax.broadcasted_iota(jnp.int32, (B, P), 1)
        h_mask = col < hidden_size

        def step(t, state):
            # Recurrent MXU matmul (bf16 operands, f32 accumulation) + the
            # precomputed additive slab [x_t@Wx + b_ih | b_emb | 0] in f32.
            pre = jnp.dot(state.astype(jnp.bfloat16), w,
                          preferred_element_type=jnp.float32) + add_ref[t]
            new_state = jnp.where(h_mask, act(pre), pre)   # act only on h cols
            out_ref[t] = new_state.astype(out_ref.dtype)   # lane-dense [B, P] store
            return new_state

        state_ref[...] = jax.lax.fori_loop(0, n_steps, step, state_ref[...],
                                           unroll=True)

    return kernel


# ---------------------------------------------------------------------------
# Wrappers
# ---------------------------------------------------------------------------
@functools.partial(jax.jit, static_argnames=("activation",))
def custom_rnn_sequence(x_seq, h0, m0, prepared, activation="tanh"):
    """Run the full recurrence in a single Pallas call.

    x_seq: [T, B, input_size]   h0: [B, hidden]   m0: [B, embed]
    returns (h_seq [T, B, hidden], m_seq [T, B, embed])
    """
    f32 = jnp.float32
    T, B, _ = x_seq.shape
    hidden_size = h0.shape[1]
    embed_size = m0.shape[1]
    HE = hidden_size + embed_size
    P = prepared["w_rec"].shape[0]

    # Time chunking: one grid step handles TC fully-unrolled recurrence steps.
    TC = T if T <= _MAX_CHUNK else _MAX_CHUNK
    T_pad = _round_up(T, TC)
    n_chunks = T_pad // TC

    # Hoisted, embarrassingly-parallel x-projection (one big batched matmul).
    xw = jnp.einsum("tbi,ih->tbh", x_seq.astype(f32), prepared["wx"],
                    preferred_element_type=f32) + prepared["b_ih"]    # [T,B,hidden]

    # Per-step additive slab [T_pad, B, P] = [x_t@Wx + b_ih | b_emb | 0 pad].
    add_seq = jnp.concatenate(
        [xw,
         jnp.broadcast_to(prepared["b_emb"], (T, B, embed_size)),
         jnp.zeros((T, B, P - HE), f32)], axis=-1)
    if T_pad != T:
        add_seq = jnp.concatenate(
            [add_seq, jnp.zeros((T_pad - T, B, P), f32)], axis=0)

    # Initial padded state [h0 | m0 | 0].
    hm0 = jnp.concatenate(
        [h0.astype(f32), m0.astype(f32), jnp.zeros((B, P - HE), f32)], axis=1)

    kernel = _make_kernel(hidden_size, TC, activation)

    out = pl.pallas_call(
        kernel,
        out_shape=jax.ShapeDtypeStruct((T_pad, B, P), x_seq.dtype),
        grid=(n_chunks,),
        in_specs=[
            pl.BlockSpec((TC, B, P), lambda c: (c, 0, 0)),   # per-chunk add slab
            pl.BlockSpec((P, P), lambda c: (0, 0)),          # resident recurrent weight
            pl.BlockSpec((B, P), lambda c: (0, 0)),          # resident initial state
        ],
        out_specs=pl.BlockSpec((TC, B, P), lambda c: (c, 0, 0)),  # lane-dense output
        scratch_shapes=[pltpu.VMEM((B, P), jnp.float32)],         # carried [h|m] state
        compiler_params=pltpu.CompilerParams(
            dimension_semantics=("arbitrary",)),                  # sequential recurrence
    )(add_seq, prepared["w_rec"], hm0)

    h_seq = out[:T, :, :hidden_size]
    m_seq = out[:T, :, hidden_size:HE]
    return h_seq, m_seq


def custom_rnn_cell(input_t, h_prev, m_prev, prepared, activation="tanh"):
    """Single-step forward matching the PyTorch module signature."""
    h_seq, m_seq = custom_rnn_sequence(input_t[None], h_prev, m_prev,
                                       prepared, activation)
    return h_seq[0], m_seq[0]


# ---------------------------------------------------------------------------
# Pure-JAX reference (f32)
# ---------------------------------------------------------------------------
def _reference_cell(input_t, h_prev, m_prev, params, activation="tanh"):
    act = jnp.tanh if activation == "tanh" else jax.nn.relu
    m_t = h_prev @ params["W_emb"].T + params["b_emb"]
    combined = jnp.concatenate([input_t, m_prev], axis=1)
    h_t = act(combined @ params["W_ih"].T + params["b_ih"])
    return h_t, m_t


def _reference_sequence(x_seq, h0, m0, params, activation="tanh"):
    h, m = h0, m0
    hs, ms = [], []
    for t in range(x_seq.shape[0]):
        h, m = _reference_cell(x_seq[t], h, m, params, activation)
        hs.append(h)
        ms.append(m)
    return jnp.stack(hs), jnp.stack(ms)


# ---------------------------------------------------------------------------
if __name__ == "__main__":
    T, B, input_size, hidden_size, embed_size = 8, 8, 16, 32, 32

    key = jax.random.PRNGKey(0)
    ks = jax.random.split(key, 7)
    x_seq = jax.random.normal(ks[0], (T, B, input_size), jnp.float32)
    h0 = jax.random.normal(ks[1], (B, hidden_size), jnp.float32)
    m0 = jax.random.normal(ks[2], (B, embed_size), jnp.float32)

    # PyTorch nn.Linear layout: W is [out, in].
    params = {
        "W_emb": jax.random.normal(ks[3], (embed_size, hidden_size), jnp.float32) * 0.1,
        "b_emb": jax.random.normal(ks[4], (embed_size,), jnp.float32) * 0.1,
        "W_ih": jax.random.normal(ks[5], (hidden_size, input_size + embed_size),
                                  jnp.float32) * 0.1,
        "b_ih": jax.random.normal(ks[6], (hidden_size,), jnp.float32) * 0.1,
    }

    # Hoisted, one-time kernel-ready weight packing.
    prepared = prepare_params(params, input_size, hidden_size, embed_size)

    # Full-sequence fused kernel (tanh).
    h_seq, m_seq = custom_rnn_sequence(x_seq, h0, m0, prepared, activation="tanh")
    jax.block_until_ready((h_seq, m_seq))
    h_ref, m_ref = _reference_sequence(x_seq, h0, m0, params, activation="tanh")
    # bf16 MXU operands in the recurrence (f32 accumulation) -> loosened tolerance.
    assert jnp.allclose(h_seq, h_ref, atol=5e-2, rtol=5e-2), "h_seq mismatch"
    assert jnp.allclose(m_seq, m_ref, atol=5e-2, rtol=5e-2), "m_seq mismatch"

    # Single-cell path (module-equivalent signature), tanh.
    h1, m1 = custom_rnn_cell(x_seq[0], h0, m0, prepared, activation="tanh")
    jax.block_until_ready((h1, m1))
    h1_ref, m1_ref = _reference_cell(x_seq[0], h0, m0, params, activation="tanh")
    assert jnp.allclose(h1, h1_ref, atol=2e-2, rtol=2e-2), "cell h mismatch"
    assert jnp.allclose(m1, m1_ref, atol=2e-2, rtol=2e-2), "cell m mismatch"

    # Relu variant of the module is also supported.
    h_r, m_r = custom_rnn_sequence(x_seq, h0, m0, prepared, activation="relu")
    jax.block_until_ready((h_r, m_r))
    h_r_ref, m_r_ref = _reference_sequence(x_seq, h0, m0, params, activation="relu")
    assert jnp.allclose(h_r, h_r_ref, atol=5e-2, rtol=5e-2), "relu h mismatch"
    assert jnp.allclose(m_r, m_r_ref, atol=5e-2, rtol=5e-2), "relu m mismatch"

    print("KERNEL_OK")
</pallas_src>

<mosaic_0001>
module attributes {stable_mosaic.version = 11 : i64} {
  func.func @kernel(%arg0: i32, %arg1: memref<8x8x128xf32, #tpu.memory_space<vmem>>, %arg2: memref<128x128xbf16, #tpu.memory_space<vmem>>, %arg3: memref<8x128xf32, #tpu.memory_space<vmem>>, %arg4: memref<8x8x128xf32, #tpu.memory_space<vmem>>, %arg5: memref<8x128xf32, #tpu.memory_space<vmem>>) attributes {dimension_semantics = [#tpu.dimension_semantics<arbitrary>], iteration_bounds = array<i64: 1>, scalar_prefetch = 0 : i64, scratch_operands = 1 : i64, tpu.core_type = #tpu.core_type<tc>, window_params = [{transform_indices = @transform_0, window_bounds = array<i64: 8, 8, 128>}, {pipeline_mode = #tpu.pipeline_mode<synchronous>, transform_indices = @transform_1, window_bounds = array<i64: 128, 128>}, {pipeline_mode = #tpu.pipeline_mode<synchronous>, transform_indices = @transform_2, window_bounds = array<i64: 8, 128>}, {transform_indices = @transform_3, window_bounds = array<i64: 8, 8, 128>}]} {
    %c0_i32 = arith.constant 0 : i32
    %0 = arith.cmpi eq, %arg0, %c0_i32 : i32
    %1 = arith.extui %0 : i1 to i32
    %c0_i32_0 = arith.constant 0 : i32
    %2 = arith.cmpi ne, %1, %c0_i32_0 : i32
    scf.if %2 {
      %c0_46 = arith.constant 0 : index
      %c0_47 = arith.constant 0 : index
      %105 = vector.load %arg3[%c0_46, %c0_47] : memref<8x128xf32, #tpu.memory_space<vmem>>, vector<8x128xf32>
      %c0_48 = arith.constant 0 : index
      %c0_49 = arith.constant 0 : index
      %106 = vector.load %arg5[%c0_48, %c0_49] : memref<8x128xf32, #tpu.memory_space<vmem>>, vector<8x128xf32>
      tpu.vector_store %arg5[%c0_48, %c0_49], %105 {strides = array<i32>} : memref<8x128xf32, #tpu.memory_space<vmem>>, vector<8x128xf32>,
    } else {
    }
    %c0 = arith.constant 0 : index
    %c0_1 = arith.constant 0 : index
    %3 = vector.load %arg2[%c0, %c0_1] : memref<128x128xbf16, #tpu.memory_space<vmem>>, vector<128x128xbf16>
    %4 = tpu.iota {dimensions = array<i32: 1>} : vector<8x128xi32>
    %c32_i32 = arith.constant 32 : i32
    %5 = vector.broadcast %c32_i32 : i32 to vector<8x128xi32>
    %6 = arith.cmpi slt, %4, %5 : vector<8x128xi32>
    %c0_2 = arith.constant 0 : index
    %c0_3 = arith.constant 0 : index
    %7 = vector.load %arg5[%c0_2, %c0_3] : memref<8x128xf32, #tpu.memory_space<vmem>>, vector<8x128xf32>
    %c0_i32_4 = arith.constant 0 : i32
    %8 = arith.truncf %7 : vector<8x128xf32> to vector<8x128xbf16>
    %cst = arith.constant dense<0.000000e+00> : vector<8x128xf32>
    %9 = tpu.matmul %8, %3, %cst {dimension_numbers = #tpu.dot_dimension_numbers<[1], [0], [0], [1], [0, 0, 1, 1], [], []>} : vector<8x128xbf16>, vector<128x128xbf16>, vector<8x128xf32> -> vector<8x128xf32>
    %10 = arith.index_cast %c0_i32_4 : i32 to index
    %c0_5 = arith.constant 0 : index
    %c0_6 = arith.constant 0 : index
    %11 = vector.load %arg1[%10, %c0_5, %c0_6] : memref<8x8x128xf32, #tpu.memory_space<vmem>>, vector<1x8x128xf32>
    %12 = vector.shape_cast %11 : vector<1x8x128xf32> to vector<8x128xf32>
    %13 = arith.addf %9, %12 : vector<8x128xf32>
    %14 = math.tanh %13 : vector<8x128xf32>
    %15 = arith.select %6, %14, %13 : vector<8x128xi1>, vector<8x128xf32>
    %16 = arith.index_cast %c0_i32_4 : i32 to index
    %c0_7 = arith.constant 0 : index
    %c0_8 = arith.constant 0 : index
    %17 = vector.load %arg4[%16, %c0_7, %c0_8] : memref<8x8x128xf32, #tpu.memory_space<vmem>>, vector<1x8x128xf32>
    %18 = vector.shape_cast %17 : vector<1x8x128xf32> to vector<8x128xf32>
    %19 = vector.shape_cast %15 : vector<8x128xf32> to vector<1x8x128xf32>
    tpu.vector_store %arg4[%16, %c0_7, %c0_8], %19 {strides = array<i32>} : memref<8x8x128xf32, #tpu.memory_space<vmem>>, vector<1x8x128xf32>,
    %c1_i32 = arith.constant 1 : i32
    %20 = arith.truncf %15 : vector<8x128xf32> to vector<8x128xbf16>
    %cst_9 = arith.constant dense<0.000000e+00> : vector<8x128xf32>
    %21 = tpu.matmul %20, %3, %cst_9 {dimension_numbers = #tpu.dot_dimension_numbers<[1], [0], [0], [1], [0, 0, 1, 1], [], []>} : vector<8x128xbf16>, vector<128x128xbf16>, vector<8x128xf32> -> vector<8x128xf32>
    %22 = arith.index_cast %c1_i32 : i32 to index
    %c0_10 = arith.constant 0 : index
    %c0_11 = arith.constant 0 : index
    %23 = vector.load %arg1[%22, %c0_10, %c0_11] : memref<8x8x128xf32, #tpu.memory_space<vmem>>, vector<1x8x128xf32>
    %24 = vector.shape_cast %23 : vector<1x8x128xf32> to vector<8x128xf32>
    %25 = arith.addf %21, %24 : vector<8x128xf32>
    %26 = math.tanh %25 : vector<8x128xf32>
    %27 = arith.select %6, %26, %25 : vector<8x128xi1>, vector<8x128xf32>
    %28 = arith.index_cast %c1_i32 : i32 to index
    %c0_12 = arith.constant 0 : index
    %c0_13 = arith.constant 0 : index
    %29 = vector.load %arg4[%28, %c0_12, %c0_13] : memref<8x8x128xf32, #tpu.memory_space<vmem>>, vector<1x8x128xf32>
    %30 = vector.shape_cast %29 : vector<1x8x128xf32> to vector<8x128xf32>
    %31 = vector.shape_cast %27 : vector<8x128xf32> to vector<1x8x128xf32>
    tpu.vector_store %arg4[%28, %c0_12, %c0_13], %31 {strides = array<i32>} : memref<8x8x128xf32, #tpu.memory_space<vmem>>, vector<1x8x128xf32>,
    %c2_i32 = arith.constant 2 : i32
    %32 = arith.truncf %27 : vector<8x128xf32> to vector<8x128xbf16>
    %cst_14 = arith.constant dense<0.000000e+00> : vector<8x128xf32>
    %33 = tpu.matmul %32, %3, %cst_14 {dimension_numbers = #tpu.dot_dimension_numbers<[1], [0], [0], [1], [0, 0, 1, 1], [], []>} : vector<8x128xbf16>, vector<128x128xbf16>, vector<8x128xf32> -> vector<8x128xf32>
    %34 = arith.index_cast %c2_i32 : i32 to index
    %c0_15 = arith.constant 0 : index
    %c0_16 = arith.constant 0 : index
    %35 = vector.load %arg1[%34, %c0_15, %c0_16] : memref<8x8x128xf32, #tpu.memory_space<vmem>>, vector<1x8x128xf32>
    %36 = vector.shape_cast %35 : vector<1x8x128xf32> to vector<8x128xf32>
    %37 = arith.addf %33, %36 : vector<8x128xf32>
    %38 = math.tanh %37 : vector<8x128xf32>
    %39 = arith.select %6, %38, %37 : vector<8x128xi1>, vector<8x128xf32>
    %40 = arith.index_cast %c2_i32 : i32 to index
    %c0_17 = arith.constant 0 : index
    %c0_18 = arith.constant 0 : index
    %41 = vector.load %arg4[%40, %c0_17, %c0_18] : memref<8x8x128xf32, #tpu.memory_space<vmem>>, vector<1x8x128xf32>
    %42 = vector.shape_cast %41 : vector<1x8x128xf32> to vector<8x128xf32>
    %43 = vector.shape_cast %39 : vector<8x128xf32> to vector<1x8x128xf32>
    tpu.vector_store %arg4[%40, %c0_17, %c0_18], %43 {strides = array<i32>} : memref<8x8x128xf32, #tpu.memory_space<vmem>>, vector<1x8x128xf32>,
    %c3_i32 = arith.constant 3 : i32
    %44 = arith.truncf %39 : vector<8x128xf32> to vector<8x128xbf16>
    %cst_19 = arith.constant dense<0.000000e+00> : vector<8x128xf32>
    %45 = tpu.matmul %44, %3, %cst_19 {dimension_numbers = #tpu.dot_dimension_numbers<[1], [0], [0], [1], [0, 0, 1, 1], [], []>} : vector<8x128xbf16>, vector<128x128xbf16>, vector<8x128xf32> -> vector<8x128xf32>
    %46 = arith.index_cast %c3_i32 : i32 to index
    %c0_20 = arith.constant 0 : index
    %c0_21 = arith.constant 0 : index
    %47 = vector.load %arg1[%46, %c0_20, %c0_21] : memref<8x8x128xf32, #tpu.memory_space<vmem>>, vector<1x8x128xf32>
    %48 = vector.shape_cast %47 : vector<1x8x128xf32> to vector<8x128xf32>
    %49 = arith.addf %45, %48 : vector<8x128xf32>
    %50 = math.tanh %49 : vector<8x128xf32>
    %51 = arith.select %6, %50, %49 : vector<8x128xi1>, vector<8x128xf32>
    %52 = arith.index_cast %c3_i32 : i32 to index
    %c0_22 = arith.constant 0 : index
    %c0_23 = arith.constant 0 : index
    %53 = vector.load %arg4[%52, %c0_22, %c0_23] : memref<8x8x128xf32, #tpu.memory_space<vmem>>, vector<1x8x128xf32>
    %54 = vector.shape_cast %53 : vector<1x8x128xf32> to vector<8x128xf32>
    %55 = vector.shape_cast %51 : vector<8x128xf32> to vector<1x8x128xf32>
    tpu.vector_store %arg4[%52, %c0_22, %c0_23], %55 {strides = array<i32>} : memref<8x8x128xf32, #tpu.memory_space<vmem>>, vector<1x8x128xf32>,
    %c4_i32 = arith.constant 4 : i32
    %56 = arith.truncf %51 : vector<8x128xf32> to vector<8x128xbf16>
    %cst_24 = arith.constant dense<0.000000e+00> : vector<8x128xf32>
    %57 = tpu.matmul %56, %3, %cst_24 {dimension_numbers = #tpu.dot_dimension_numbers<[1], [0], [0], [1], [0, 0, 1, 1], [], []>} : vector<8x128xbf16>, vector<128x128xbf16>, vector<8x128xf32> -> vector<8x128xf32>
    %58 = arith.index_cast %c4_i32 : i32 to index
    %c0_25 = arith.constant 0 : index
    %c0_26 = arith.constant 0 : index
    %59 = vector.load %arg1[%58, %c0_25, %c0_26] : memref<8x8x128xf32, #tpu.memory_space<vmem>>, vector<1x8x128xf32>
    %60 = vector.shape_cast %59 : vector<1x8x128xf32> to vector<8x128xf32>
    %61 = arith.addf %57, %60 : vector<8x128xf32>
    %62 = math.tanh %61 : vector<8x128xf32>
    %63 = arith.select %6, %62, %61 : vector<8x128xi1>, vector<8x128xf32>
    %64 = arith.index_cast %c4_i32 : i32 to index
    %c0_27 = arith.constant 0 : index
    %c0_28 = arith.constant 0 : index
    %65 = vector.load %arg4[%64, %c0_27, %c0_28] : memref<8x8x128xf32, #tpu.memory_space<vmem>>, vector<1x8x128xf32>
    %66 = vector.shape_cast %65 : vector<1x8x128xf32> to vector<8x128xf32>
    %67 = vector.shape_cast %63 : vector<8x128xf32> to vector<1x8x128xf32>
    tpu.vector_store %arg4[%64, %c0_27, %c0_28], %67 {strides = array<i32>} : memref<8x8x128xf32, #tpu.memory_space<vmem>>, vector<1x8x128xf32>,
    %c5_i32 = arith.constant 5 : i32
    %68 = arith.truncf %63 : vector<8x128xf32> to vector<8x128xbf16>
    %cst_29 = arith.constant dense<0.000000e+00> : vector<8x128xf32>
    %69 = tpu.matmul %68, %3, %cst_29 {dimension_numbers = #tpu.dot_dimension_numbers<[1], [0], [0], [1], [0, 0, 1, 1], [], []>} : vector<8x128xbf16>, vector<128x128xbf16>, vector<8x128xf32> -> vector<8x128xf32>
    %70 = arith.index_cast %c5_i32 : i32 to index
    %c0_30 = arith.constant 0 : index
    %c0_31 = arith.constant 0 : index
    %71 = vector.load %arg1[%70, %c0_30, %c0_31] : memref<8x8x128xf32, #tpu.memory_space<vmem>>, vector<1x8x128xf32>
    %72 = vector.shape_cast %71 : vector<1x8x128xf32> to vector<8x128xf32>
    %73 = arith.addf %69, %72 : vector<8x128xf32>
    %74 = math.tanh %73 : vector<8x128xf32>
    %75 = arith.select %6, %74, %73 : vector<8x128xi1>, vector<8x128xf32>
    %76 = arith.index_cast %c5_i32 : i32 to index
    %c0_32 = arith.constant 0 : index
    %c0_33 = arith.constant 0 : index
    %77 = vector.load %arg4[%76, %c0_32, %c0_33] : memref<8x8x128xf32, #tpu.memory_space<vmem>>, vector<1x8x128xf32>
    %78 = vector.shape_cast %77 : vector<1x8x128xf32> to vector<8x128xf32>
    %79 = vector.shape_cast %75 : vector<8x128xf32> to vector<1x8x128xf32>
    tpu.vector_store %arg4[%76, %c0_32, %c0_33], %79 {strides = array<i32>} : memref<8x8x128xf32, #tpu.memory_space<vmem>>, vector<1x8x128xf32>,
    %c6_i32 = arith.constant 6 : i32
    %80 = arith.truncf %75 : vector<8x128xf32> to vector<8x128xbf16>
    %cst_34 = arith.constant dense<0.000000e+00> : vector<8x128xf32>
    %81 = tpu.matmul %80, %3, %cst_34 {dimension_numbers = #tpu.dot_dimension_numbers<[1], [0], [0], [1], [0, 0, 1, 1], [], []>} : vector<8x128xbf16>, vector<128x128xbf16>, vector<8x128xf32> -> vector<8x128xf32>
    %82 = arith.index_cast %c6_i32 : i32 to index
    %c0_35 = arith.constant 0 : index
    %c0_36 = arith.constant 0 : index
    %83 = vector.load %arg1[%82, %c0_35, %c0_36] : memref<8x8x128xf32, #tpu.memory_space<vmem>>, vector<1x8x128xf32>
    %84 = vector.shape_cast %83 : vector<1x8x128xf32> to vector<8x128xf32>
    %85 = arith.addf %81, %84 : vector<8x128xf32>
    %86 = math.tanh %85 : vector<8x128xf32>
    %87 = arith.select %6, %86, %85 : vector<8x128xi1>, vector<8x128xf32>
    %88 = arith.index_cast %c6_i32 : i32 to index
    %c0_37 = arith.constant 0 : index
    %c0_38 = arith.constant 0 : index
    %89 = vector.load %arg4[%88, %c0_37, %c0_38] : memref<8x8x128xf32, #tpu.memory_space<vmem>>, vector<1x8x128xf32>
    %90 = vector.shape_cast %89 : vector<1x8x128xf32> to vector<8x128xf32>
    %91 = vector.shape_cast %87 : vector<8x128xf32> to vector<1x8x128xf32>
    tpu.vector_store %arg4[%88, %c0_37, %c0_38], %91 {strides = array<i32>} : memref<8x8x128xf32, #tpu.memory_space<vmem>>, vector<1x8x128xf32>,
    %c7_i32 = arith.constant 7 : i32
    %92 = arith.truncf %87 : vector<8x128xf32> to vector<8x128xbf16>
    %cst_39 = arith.constant dense<0.000000e+00> : vector<8x128xf32>
    %93 = tpu.matmul %92, %3, %cst_39 {dimension_numbers = #tpu.dot_dimension_numbers<[1], [0], [0], [1], [0, 0, 1, 1], [], []>} : vector<8x128xbf16>, vector<128x128xbf16>, vector<8x128xf32> -> vector<8x128xf32>
    %94 = arith.index_cast %c7_i32 : i32 to index
    %c0_40 = arith.constant 0 : index
    %c0_41 = arith.constant 0 : index
    %95 = vector.load %arg1[%94, %c0_40, %c0_41] : memref<8x8x128xf32, #tpu.memory_space<vmem>>, vector<1x8x128xf32>
    %96 = vector.shape_cast %95 : vector<1x8x128xf32> to vector<8x128xf32>
    %97 = arith.addf %93, %96 : vector<8x128xf32>
    %98 = math.tanh %97 : vector<8x128xf32>
    %99 = arith.select %6, %98, %97 : vector<8x128xi1>, vector<8x128xf32>
    %100 = arith.index_cast %c7_i32 : i32 to index
    %c0_42 = arith.constant 0 : index
    %c0_43 = arith.constant 0 : index
    %101 = vector.load %arg4[%100, %c0_42, %c0_43] : memref<8x8x128xf32, #tpu.memory_space<vmem>>, vector<1x8x128xf32>
    %102 = vector.shape_cast %101 : vector<1x8x128xf32> to vector<8x128xf32>
    %103 = vector.shape_cast %99 : vector<8x128xf32> to vector<1x8x128xf32>
    tpu.vector_store %arg4[%100, %c0_42, %c0_43], %103 {strides = array<i32>} : memref<8x8x128xf32, #tpu.memory_space<vmem>>, vector<1x8x128xf32>,
    %c8_i32 = arith.constant 8 : i32
    %c0_44 = arith.constant 0 : index
    %c0_45 = arith.constant 0 : index
    %104 = vector.load %arg5[%c0_44, %c0_45] : memref<8x128xf32, #tpu.memory_space<vmem>>, vector<8x128xf32>
    tpu.vector_store %arg5[%c0_44, %c0_45], %99 {strides = array<i32>} : memref<8x128xf32, #tpu.memory_space<vmem>>, vector<8x128xf32>,
    return
  }
  func.func @transform_0(%arg0: i32) -> (i32, i32, i32) {
    %c0_i32 = arith.constant 0 : i32
    %c0_i32_0 = arith.constant 0 : i32
    %c0_i32_1 = arith.constant 0 : i32
    return %arg0, %c0_i32, %c0_i32_0 : i32, i32, i32
  }
  func.func @transform_1(%arg0: i32) -> (i32, i32) {
    %c0_i32 = arith.constant 0 : i32
    %c0_i32_0 = arith.constant 0 : i32
    %c0_i32_1 = arith.constant 0 : i32
    return %c0_i32, %c0_i32_0 : i32, i32
  }
  func.func @transform_2(%arg0: i32) -> (i32, i32) {
    %c0_i32 = arith.constant 0 : i32
    %c0_i32_0 = arith.constant 0 : i32
    %c0_i32_1 = arith.constant 0 : i32
    return %c0_i32, %c0_i32_0 : i32, i32
  }
  func.func @transform_3(%arg0: i32) -> (i32, i32, i32) {
    %c0_i32 = arith.constant 0 : i32
    %c0_i32_0 = arith.constant 0 : i32
    %c0_i32_1 = arith.constant 0 : i32
    return %arg0, %c0_i32, %c0_i32_0 : i32, i32, i32
  }
}

</mosaic_0001>

<bundles_post_ra>
// kernel: custom_rnn_sequence.1
= control target key start
LH: loop header
LB: loop body
LE: loop exit
PB: predicated region body
PF: predicated region fallthrough
CT: control target
= control target key end

     0   :  { %v748_v0 = vmov 0.0   ;;  %vm749_vm0 = vmmov 0   ;;  %v37_v17 = vlaneseq  ;;  %s1024_s1 = inlined_call_operand.vmem [shape: bf16[128,128], index: 1, kind: input, shape index: {}]   ;;  %s1025_s2 = inlined_call_operand.vmem [shape: f32[8,128], index: 2, kind: input, shape index: {}]   ;;  %s1026_s0 = inlined_call_operand.vmem [shape: f32[8,8,128], index: 0, kind: input, shape index: {}]   ;;  %s1027_s3 = inlined_call_operand.vmem [shape: f32[8,8,128], index: 3, kind: output, shape index: {}]  }
   0x1   :  { %562 = vmatprep.subr.bf16.mxu0 %v748_v0  ;;  %v774_v1 = vld [vmem:[%s1024_s1 + $0x38] sm:$0xff]   ;;  %578 = vmatprep.mubr.msk.bf16.mxu0 %vm749_vm0, %v748_v0  ;;  %v785_v2 = vld [vmem:[%s1024_s1 + $0x30] sm:$0xff]   ;;  %v794_v3 = vld [vmem:[%s1024_s1 + $0x28] sm:$0xff]  }
   0x2   :  { %582 = vmatprep.subr.bf16.mxu1 %v748_v0  ;;  %598 = vmatprep.mubr.msk.bf16.mxu1 %vm749_vm0, %v748_v0  ;;  %v803_v4 = vld [vmem:[%s1024_s1 + $0x20] sm:$0xff]   ;;  %v812_v5 = vld [vmem:[%s1024_s1 + $0x18] sm:$0xff]   ;;  %v821_v6 = vld [vmem:[%s1024_s1 + $0x10] sm:$0xff]   ;;  %v872_v18 = vand.u32 127, %v37_v17 }
   0x3   :  { %563 = vmatpush3.bf16.msra.mxu0 %v774_v1  ;;  %583 = vmatpush3.bf16.msra.mxu1 %v774_v1  ;;  %v830_v7 = vld [vmem:[%s1024_s1 + $0x8] sm:$0xff]   ;;  %v839_v8 = vld [vmem:[%s1024_s1] sm:$0xff]   ;;  %v478_v31 = vld [vmem:[%s1026_s0 + $0x10] sm:$0xff] }
   0x4   :  { %564 = vmatprep.subr.bf16.mxu0 %v748_v0  ;;  %584 = vmatprep.subr.bf16.mxu1 %v748_v0  ;;  %v19_v9 = vld [vmem:[%s1025_s2] sm:$0xff]  ;;  %vm39_vm1 = vcmp.lt.s32.totalorder %v872_v18, 32  ;;  %v476_v22 = vld [vmem:[%s1026_s0 + $0x8] sm:$0xff]  ;;  %v480_v40 = vld [vmem:[%s1026_s0 + $0x18] sm:$0xff] }
   0x5   :  { %v41_v10 = vpack.c.bf16 %v19_v9, %v19_v9  ;;  %v42_v11 = vld [vmem:[%s1026_s0] sm:$0xff]  ;;  %v484_v58 = vld [vmem:[%s1026_s0 + $0x28] sm:$0xff] }
   0x6   :  { %v482_v49 = vld [vmem:[%s1026_s0 + $0x20] sm:$0xff] }
   0x7   :  { %565 = vmatpush3.bf16.msra.mxu0 %v785_v2  ;;  %585 = vmatpush3.bf16.msra.mxu1 %v785_v2 }
   0x8   :  { %566 = vmatprep.subr.bf16.mxu0 %v748_v0  ;;  %586 = vmatprep.subr.bf16.mxu1 %v748_v0 }
   0xb   :  { %567 = vmatpush3.bf16.msra.mxu0 %v794_v3  ;;  %587 = vmatpush3.bf16.msra.mxu1 %v794_v3 }
   0xc   :  { %568 = vmatprep.subr.bf16.mxu0 %v748_v0  ;;  %588 = vmatprep.subr.bf16.mxu1 %v748_v0 }
   0xf   :  { %569 = vmatpush3.bf16.msra.mxu0 %v803_v4  ;;  %589 = vmatpush3.bf16.msra.mxu1 %v803_v4 }
  0x10   :  { %570 = vmatprep.subr.bf16.mxu0 %v748_v0  ;;  %590 = vmatprep.subr.bf16.mxu1 %v748_v0 }
  0x13   :  { %571 = vmatpush3.bf16.msra.mxu0 %v812_v5  ;;  %591 = vmatpush3.bf16.msra.mxu1 %v812_v5 }
  0x14   :  { %572 = vmatprep.subr.bf16.mxu0 %v748_v0  ;;  %592 = vmatprep.subr.bf16.mxu1 %v748_v0 }
  0x17   :  { %573 = vmatpush3.bf16.msra.mxu0 %v821_v6  ;;  %593 = vmatpush3.bf16.msra.mxu1 %v821_v6 }
  0x18   :  { %574 = vmatprep.subr.bf16.mxu0 %v748_v0  ;;  %594 = vmatprep.subr.bf16.mxu1 %v748_v0 }
  0x1b   :  { %575 = vmatpush3.bf16.msra.mxu0 %v830_v7  ;;  %595 = vmatpush3.bf16.msra.mxu1 %v830_v7 }
  0x1c   :  { %576 = vmatprep.subr.bf16.mxu0 %v748_v0  ;;  %596 = vmatprep.subr.bf16.mxu1 %v748_v0 }
  0x1f   :  { %577 = vmatpush3.bf16.msra.mxu0 %v839_v8  ;;  %597 = vmatpush3.bf16.msra.mxu1 %v839_v8 }
  0x20   :  { %602 = vmatprep.subr.bf16.mxu0 %v748_v0  ;;  %622 = vmatprep.subr.bf16.mxu1 %v748_v0 }
  0x22   :  { %579 = vmatmul.mubr.bf16.vlgmr.msra.gmra.mxu0 %v41_v10 }
  0x23   :  { %603 = vmatpush3.bf16.msra.mxu0 %v774_v1  ;;  %618 = vmatprep.mubr.msk.bf16.mxu0 %vm749_vm0, %v748_v0 }
  0x24   :  { %604 = vmatprep.subr.bf16.mxu0 %v748_v0 }
  0x27   :  { %605 = vmatpush3.bf16.msra.mxu0 %v785_v2 }
  0x28   :  { %606 = vmatprep.subr.bf16.mxu0 %v748_v0 }
  0x2b   :  { %607 = vmatpush3.bf16.msra.mxu0 %v794_v3 }
  0x2c   :  { %608 = vmatprep.subr.bf16.mxu0 %v748_v0 }
  0x2f   :  { %609 = vmatpush3.bf16.msra.mxu0 %v803_v4 }
  0x30   :  { %610 = vmatprep.subr.bf16.mxu0 %v748_v0 }
  0x33   :  { %611 = vmatpush3.bf16.msra.mxu0 %v812_v5 }
  0x34   :  { %612 = vmatprep.subr.bf16.mxu0 %v748_v0 }
  0x37   :  { %613 = vmatpush3.bf16.msra.mxu0 %v821_v6 }
  0x38   :  { %614 = vmatprep.subr.bf16.mxu0 %v748_v0 }
  0x3b   :  { %615 = vmatpush3.bf16.msra.mxu0 %v830_v7 }
  0x3c   :  { %616 = vmatprep.subr.bf16.mxu0 %v748_v0 }
  0x3f   :  { %617 = vmatpush3.bf16.msra.mxu0 %v839_v8 }
  0x40   :  { %642 = vmatprep.subr.bf16.mxu0 %v748_v0 }
  0xe2   :  { %v125_v12 = vpop.f32.mrf.mxu0 }
  0xe3   :  { %v126_v13 = vadd.f32 %v125_v12, %v42_v11  ;;  %v488_v12 = vld [vmem:[%s1026_s0 + $0x38] sm:$0xff] }
  0xe4   :  { %v580_v14 = vpop.f32.mrf.mxu0 }
  0xe5   :  { %732 = vtanh.f32 %v126_v13 }
  0xe6   :  { %v128_v15 = vpop.f32.mrf.mxu0 }
  0xe8   :  { %v581_v16 = vpop.f32.mrf.mxu0 }
  0xf2   :  { %v733_v19 = vpop.eup %732 }
  0xf3   :  { %v132_v20 = vsel %vm39_vm1, %v733_v19, %v126_v13 }
  0xf4   :  { %133 = vst [vmem:[%s1027_s3] sm:$0xff] %v132_v20  ;;  %v134_v21 = vpack.c.bf16 %v132_v20, %v132_v20 }
  0xf6   :  { %599 = vmatmul.mubr.bf16.vlgmr.msra.gmra.mxu1 %v134_v21 }
  0xf7   :  { %623 = vmatpush3.bf16.msra.mxu1 %v774_v1  ;;  %638 = vmatprep.mubr.msk.bf16.mxu1 %vm749_vm0, %v748_v0 }
  0xf8   :  { %624 = vmatprep.subr.bf16.mxu1 %v748_v0 }
  0xfb   :  { %625 = vmatpush3.bf16.msra.mxu1 %v785_v2 }
  0xfc   :  { %626 = vmatprep.subr.bf16.mxu1 %v748_v0 }
  0xff   :  { %627 = vmatpush3.bf16.msra.mxu1 %v794_v3 }
 0x100   :  { %628 = vmatprep.subr.bf16.mxu1 %v748_v0 }
 0x103   :  { %629 = vmatpush3.bf16.msra.mxu1 %v803_v4 }
 0x104   :  { %630 = vmatprep.subr.bf16.mxu1 %v748_v0 }
 0x107   :  { %631 = vmatpush3.bf16.msra.mxu1 %v812_v5 }
 0x108   :  { %632 = vmatprep.subr.bf16.mxu1 %v748_v0 }
 0x10b   :  { %633 = vmatpush3.bf16.msra.mxu1 %v821_v6 }
 0x10c   :  { %634 = vmatprep.subr.bf16.mxu1 %v748_v0 }
 0x10f   :  { %635 = vmatpush3.bf16.msra.mxu1 %v830_v7 }
 0x110   :  { %636 = vmatprep.subr.bf16.mxu1 %v748_v0 }
 0x113   :  { %637 = vmatpush3.bf16.msra.mxu1 %v839_v8 }
 0x114   :  { %662 = vmatprep.subr.bf16.mxu1 %v748_v0 }
 0x1b6   :  { %v171_v23 = vpop.f32.mrf.mxu1 }
 0x1b7   :  { %v172_v24 = vadd.f32 %v476_v22, %v171_v23 }
 0x1b8   :  { %v600_v25 = vpop.f32.mrf.mxu1 }
 0x1b9   :  { %734 = vtanh.f32 %v172_v24 }
 0x1ba   :  { %v174_v26 = vpop.f32.mrf.mxu1 }
 0x1bc   :  { %v601_v27 = vpop.f32.mrf.mxu1 }
 0x1c6   :  { %v735_v28 = vpop.eup %734 }
 0x1c7   :  { %v178_v29 = vsel %vm39_vm1, %v735_v28, %v172_v24 }
 0x1c8   :  { %477 = vst [vmem:[%s1027_s3 + $0x8] sm:$0xff] %v178_v29  ;;  %v181_v30 = vpack.c.bf16 %v178_v29, %v178_v29 }
 0x1ca   :  { %619 = vmatmul.mubr.bf16.vlgmr.msra.gmra.mxu0 %v181_v30 }
 0x1cb   :  { %643 = vmatpush3.bf16.msra.mxu0 %v774_v1  ;;  %658 = vmatprep.mubr.msk.bf16.mxu0 %vm749_vm0, %v748_v0 }
 0x1cc   :  { %644 = vmatprep.subr.bf16.mxu0 %v748_v0 }
 0x1cf   :  { %645 = vmatpush3.bf16.msra.mxu0 %v785_v2 }
 0x1d0   :  { %646 = vmatprep.subr.bf16.mxu0 %v748_v0 }
 0x1d3   :  { %647 = vmatpush3.bf16.msra.mxu0 %v794_v3 }
 0x1d4   :  { %648 = vmatprep.subr.bf16.mxu0 %v748_v0 }
 0x1d7   :  { %649 = vmatpush3.bf16.msra.mxu0 %v803_v4 }
 0x1d8   :  { %650 = vmatprep.subr.bf16.mxu0 %v748_v0 }
 0x1db   :  { %651 = vmatpush3.bf16.msra.mxu0 %v812_v5 }
 0x1dc   :  { %652 = vmatprep.subr.bf16.mxu0 %v748_v0 }
 0x1df   :  { %653 = vmatpush3.bf16.msra.mxu0 %v821_v6 }
 0x1e0   :  { %654 = vmatprep.subr.bf16.mxu0 %v748_v0 }
 0x1e3   :  { %655 = vmatpush3.bf16.msra.mxu0 %v830_v7 }
 0x1e4   :  { %656 = vmatprep.subr.bf16.mxu0 %v748_v0 }
 0x1e7   :  { %657 = vmatpush3.bf16.msra.mxu0 %v839_v8 }
 0x1e8   :  { %682 = vmatprep.subr.bf16.mxu0 %v748_v0 }
 0x28a   :  { %v218_v32 = vpop.f32.mrf.mxu0 }
 0x28b   :  { %v219_v33 = vadd.f32 %v478_v31, %v218_v32 }
 0x28c   :  { %v620_v34 = vpop.f32.mrf.mxu0 }
 0x28d   :  { %736 = vtanh.f32 %v219_v33 }
 0x28e   :  { %v221_v35 = vpop.f32.mrf.mxu0 }
 0x290   :  { %v621_v36 = vpop.f32.mrf.mxu0 }
 0x29a   :  { %v737_v37 = vpop.eup %736 }
 0x29b   :  { %v225_v38 = vsel %vm39_vm1, %v737_v37, %v219_v33 }
 0x29c   :  { %479 = vst [vmem:[%s1027_s3 + $0x10] sm:$0xff] %v225_v38  ;;  %v228_v39 = vpack.c.bf16 %v225_v38, %v225_v38 }
 0x29e   :  { %639 = vmatmul.mubr.bf16.vlgmr.msra.gmra.mxu1 %v228_v39 }
 0x29f   :  { %663 = vmatpush3.bf16.msra.mxu1 %v774_v1  ;;  %678 = vmatprep.mubr.msk.bf16.mxu1 %vm749_vm0, %v748_v0 }
 0x2a0   :  { %664 = vmatprep.subr.bf16.mxu1 %v748_v0 }
 0x2a3   :  { %665 = vmatpush3.bf16.msra.mxu1 %v785_v2 }
 0x2a4   :  { %666 = vmatprep.subr.bf16.mxu1 %v748_v0 }
 0x2a7   :  { %667 = vmatpush3.bf16.msra.mxu1 %v794_v3 }
 0x2a8   :  { %668 = vmatprep.subr.bf16.mxu1 %v748_v0 }
 0x2ab   :  { %669 = vmatpush3.bf16.msra.mxu1 %v803_v4 }
 0x2ac   :  { %670 = vmatprep.subr.bf16.mxu1 %v748_v0 }
 0x2af   :  { %671 = vmatpush3.bf16.msra.mxu1 %v812_v5 }
 0x2b0   :  { %672 = vmatprep.subr.bf16.mxu1 %v748_v0 }
 0x2b3   :  { %673 = vmatpush3.bf16.msra.mxu1 %v821_v6 }
 0x2b4   :  { %674 = vmatprep.subr.bf16.mxu1 %v748_v0 }
 0x2b7   :  { %675 = vmatpush3.bf16.msra.mxu1 %v830_v7 }
 0x2b8   :  { %676 = vmatprep.subr.bf16.mxu1 %v748_v0 }
 0x2bb   :  { %677 = vmatpush3.bf16.msra.mxu1 %v839_v8 }
 0x2bc   :  { %702 = vmatprep.subr.bf16.mxu1 %v748_v0 }
 0x35e   :  { %v265_v41 = vpop.f32.mrf.mxu1 }
 0x35f   :  { %v266_v42 = vadd.f32 %v480_v40, %v265_v41 }
 0x360   :  { %v640_v43 = vpop.f32.mrf.mxu1 }
 0x361   :  { %738 = vtanh.f32 %v266_v42 }
 0x362   :  { %v268_v44 = vpop.f32.mrf.mxu1 }
 0x364   :  { %v641_v45 = vpop.f32.mrf.mxu1 }
 0x36e   :  { %v739_v46 = vpop.eup %738 }
 0x36f   :  { %v272_v47 = vsel %vm39_vm1, %v739_v46, %v266_v42 }
 0x370   :  { %481 = vst [vmem:[%s1027_s3 + $0x18] sm:$0xff] %v272_v47  ;;  %v275_v48 = vpack.c.bf16 %v272_v47, %v272_v47 }
 0x372   :  { %659 = vmatmul.mubr.bf16.vlgmr.msra.gmra.mxu0 %v275_v48 }
 0x373   :  { %683 = vmatpush3.bf16.msra.mxu0 %v774_v1  ;;  %698 = vmatprep.mubr.msk.bf16.mxu0 %vm749_vm0, %v748_v0 }
 0x374   :  { %684 = vmatprep.subr.bf16.mxu0 %v748_v0 }
 0x377   :  { %685 = vmatpush3.bf16.msra.mxu0 %v785_v2 }
 0x378   :  { %686 = vmatprep.subr.bf16.mxu0 %v748_v0 }
 0x37b   :  { %687 = vmatpush3.bf16.msra.mxu0 %v794_v3 }
 0x37c   :  { %688 = vmatprep.subr.bf16.mxu0 %v748_v0 }
 0x37f   :  { %689 = vmatpush3.bf16.msra.mxu0 %v803_v4 }
 0x380   :  { %690 = vmatprep.subr.bf16.mxu0 %v748_v0 }
 0x383   :  { %691 = vmatpush3.bf16.msra.mxu0 %v812_v5 }
 0x384   :  { %692 = vmatprep.subr.bf16.mxu0 %v748_v0 }
 0x387   :  { %693 = vmatpush3.bf16.msra.mxu0 %v821_v6 }
 0x388   :  { %694 = vmatprep.subr.bf16.mxu0 %v748_v0 }
 0x38b   :  { %695 = vmatpush3.bf16.msra.mxu0 %v830_v7 }
 0x38c   :  { %696 = vmatprep.subr.bf16.mxu0 %v748_v0 }
 0x38f   :  { %697 = vmatpush3.bf16.msra.mxu0 %v839_v8 }
 0x432   :  { %v312_v50 = vpop.f32.mrf.mxu0 }
 0x433   :  { %v313_v51 = vadd.f32 %v482_v49, %v312_v50 }
 0x434   :  { %v660_v52 = vpop.f32.mrf.mxu0 }
 0x435   :  { %740 = vtanh.f32 %v313_v51 }
 0x436   :  { %v315_v53 = vpop.f32.mrf.mxu0 }
 0x438   :  { %v661_v54 = vpop.f32.mrf.mxu0 }
 0x442   :  { %v741_v55 = vpop.eup %740 }
 0x443   :  { %v319_v56 = vsel %vm39_vm1, %v741_v55, %v313_v51 }
 0x444   :  { %483 = vst [vmem:[%s1027_s3 + $0x20] sm:$0xff] %v319_v56  ;;  %v322_v57 = vpack.c.bf16 %v319_v56, %v319_v56 }
 0x446   :  { %679 = vmatmul.mubr.bf16.vlgmr.msra.gmra.mxu1 %v322_v57 }
 0x447   :  { %703 = vmatpush3.bf16.msra.mxu1 %v774_v1  ;;  %718 = vmatprep.mubr.msk.bf16.mxu1 %vm749_vm0, %v748_v0 }
 0x448   :  { %704 = vmatprep.subr.bf16.mxu1 %v748_v0 }
 0x44b   :  { %705 = vmatpush3.bf16.msra.mxu1 %v785_v2 }
 0x44c   :  { %706 = vmatprep.subr.bf16.mxu1 %v748_v0 }
 0x44f   :  { %707 = vmatpush3.bf16.msra.mxu1 %v794_v3  ;;  %v486_v3 = vld [vmem:[%s1026_s0 + $0x30] sm:$0xff] }
 0x450   :  { %708 = vmatprep.subr.bf16.mxu1 %v748_v0 }
 0x453   :  { %709 = vmatpush3.bf16.msra.mxu1 %v803_v4 }
 0x454   :  { %710 = vmatprep.subr.bf16.mxu1 %v748_v0 }
 0x457   :  { %711 = vmatpush3.bf16.msra.mxu1 %v812_v5 }
 0x458   :  { %712 = vmatprep.subr.bf16.mxu1 %v748_v0 }
 0x45b   :  { %713 = vmatpush3.bf16.msra.mxu1 %v821_v6 }
 0x45c   :  { %714 = vmatprep.subr.bf16.mxu1 %v748_v0 }
 0x45f   :  { %715 = vmatpush3.bf16.msra.mxu1 %v830_v7 }
 0x460   :  { %716 = vmatprep.subr.bf16.mxu1 %v748_v0 }
 0x463   :  { %717 = vmatpush3.bf16.msra.mxu1 %v839_v8 }
 0x506   :  { %v359_v59 = vpop.f32.mrf.mxu1 }
 0x507   :  { %v360_v60 = vadd.f32 %v484_v58, %v359_v59 }
 0x508   :  { %v680_v61 = vpop.f32.mrf.mxu1 }
 0x509   :  { %742 = vtanh.f32 %v360_v60 }
 0x50a   :  { %v362_v62 = vpop.f32.mrf.mxu1 }
 0x50c   :  { %v681_v63 = vpop.f32.mrf.mxu1 }
 0x516   :  { %v743_v1 = vpop.eup %742 }
 0x517   :  { %v366_v2 = vsel %vm39_vm1, %v743_v1, %v360_v60 }
 0x518   :  { %485 = vst [vmem:[%s1027_s3 + $0x28] sm:$0xff] %v366_v2  ;;  %v369_v0 = vpack.c.bf16 %v366_v2, %v366_v2 }
 0x51a   :  { %699 = vmatmul.mubr.bf16.vlgmr.msra.gmra.mxu0 %v369_v0 }
 0x5da   :  { %v406_v4 = vpop.f32.mrf.mxu0 }
 0x5db   :  { %v407_v5 = vadd.f32 %v486_v3, %v406_v4 }
 0x5dc   :  { %v700_v6 = vpop.f32.mrf.mxu0 }
 0x5dd   :  { %744 = vtanh.f32 %v407_v5 }
 0x5de   :  { %v409_v7 = vpop.f32.mrf.mxu0 }
 0x5e0   :  { %v701_v8 = vpop.f32.mrf.mxu0 }
 0x5ea   :  { %v745_v9 = vpop.eup %744 }
 0x5eb   :  { %v413_v10 = vsel %vm39_vm1, %v745_v9, %v407_v5 }
 0x5ec   :  { %487 = vst [vmem:[%s1027_s3 + $0x30] sm:$0xff] %v413_v10  ;;  %v416_v11 = vpack.c.bf16 %v413_v10, %v413_v10 }
 0x5ee   :  { %719 = vmatmul.mubr.bf16.vlgmr.msra.gmra.mxu1 %v416_v11 }
 0x6ae   :  { %v453_v13 = vpop.f32.mrf.mxu1 }
 0x6af   :  { %v454_v14 = vadd.f32 %v488_v12, %v453_v13 }
 0x6b0   :  { %v720_v15 = vpop.f32.mrf.mxu1 }
 0x6b1   :  { %746 = vtanh.f32 %v454_v14 }
 0x6b2   :  { %v456_v16 = vpop.f32.mrf.mxu1 }
 0x6b4   :  { %v721_v17 = vpop.f32.mrf.mxu1 }
 0x6be   :  { %v747_v19 = vpop.eup %746 }
 0x6bf   :  { %v460_v20 = vsel %vm39_vm1, %v747_v19, %v454_v14 }
 0x6c0   :  { %489 = vst [vmem:[%s1027_s3 + $0x38] sm:$0xff] %v460_v20 }

</bundles_post_ra>
